<compile_context>
chip_gen: v7x
topology: tpu7x:2x2x1
jax: 0.10.0
libtpu: 0.0.40
codegen_flags: <defaults>
</compile_context>

<pallas_src>
import math

import jax
import jax.numpy as jnp
from jax.experimental import pallas as pl
from jax.experimental.pallas import tpu as pltpu

# ---- scaled-down configuration (consistent with t2s.__init__ formulas) ----
B = 2                 # batch
CLIP_DIM = 64         # CLIP text-embedding dim (stand-in for 512)
HIDDEN = 64           # mapper hidden width
LATENT = 32           # per-style latent dim (stand-in for 512)
OUTPUT_SIZE = 16      # decoder output spatial size (stand-in for 1024)
N_STYLES = int(math.log(OUTPUT_SIZE, 2)) * 2 - 2   # == 6, same formula as t2s
SD = N_STYLES * LATENT                             # 192
IMG_C = 3
POOL_OUT = 8          # face_pool target (stand-in for fixed 256x256)
POOL_K = OUTPUT_SIZE // POOL_OUT
POOLED_PIX = IMG_C * POOL_OUT * POOL_OUT           # 192


# ------------------------------------------------------------------
# Single fused kernel: encoder MLP + heads + latent_avg add + synthesis
# matmul (with the average pool folded into its weights).
# All operands are tiny (< 300 KiB total), so everything lives in VMEM
# with no grid — one invocation, zero intermediate HBM traffic.
# ------------------------------------------------------------------
def _t2s_fused_kernel(e_ref, w_e_ref, b_e_ref, w_ml_ref, b_ml_ref,
                      lat_ref, w_syn_ref, b_syn_ref,
                      img_ref, mu_ref, lv_ref, pm_ref, codes_ref):
    e = e_ref[...]                                                     # (B, CLIP_DIM)

    # (h_pre | prior_mu): one matmul shares the `e` load, N = HIDDEN+SD = 256.
    eh = jnp.dot(e, w_e_ref[...], preferred_element_type=jnp.float32) + b_e_ref[...]
    h_pre = eh[:, :HIDDEN]
    prior_mu = eh[:, HIDDEN:]
    h = jnp.where(h_pre >= 0.0, h_pre, 0.2 * h_pre)                    # LeakyReLU(0.2)

    # (mu | log_var): one matmul on h, N = 2*SD = 384 (multiple of 128).
    ml = jnp.dot(h, w_ml_ref[...], preferred_element_type=jnp.float32) + b_ml_ref[...]
    mu = ml[:, :SD]
    log_var = ml[:, SD:]

    # zero_var=True -> no reparameterization noise: codes == mu.
    # start_from_latent_avg (learn_in_w=False): fused add on the flat view.
    codes = mu + lat_ref[...]                                          # (B, SD)

    # Decoder synthesis; AdaptiveAvgPool2d is linear and already folded into
    # w_syn_pooled / b_syn_pooled, so this directly produces pooled pixels.
    img = jnp.dot(codes, w_syn_ref[...], preferred_element_type=jnp.float32) + b_syn_ref[...]

    img_ref[...] = img
    mu_ref[...] = mu
    lv_ref[...] = log_var
    pm_ref[...] = prior_mu
    codes_ref[...] = codes


# ------------------------------------------------------------------
# Parameters (deterministic synthetic init; the real module loads a ckpt)
# ------------------------------------------------------------------
def init_params(key):
    ks = jax.random.split(key, 8)
    pix = IMG_C * OUTPUT_SIZE * OUTPUT_SIZE
    return {
        # encoder (simplified StyleCLIPMapper with VAE-style heads)
        "w_h": jax.random.normal(ks[0], (CLIP_DIM, HIDDEN), jnp.float32) * 0.05,
        "b_h": jnp.zeros((HIDDEN,), jnp.float32),
        "w_mu": jax.random.normal(ks[1], (HIDDEN, SD), jnp.float32) * 0.05,
        "b_mu": jnp.zeros((SD,), jnp.float32),
        "w_lv": jax.random.normal(ks[2], (HIDDEN, SD), jnp.float32) * 0.05,
        "b_lv": jnp.zeros((SD,), jnp.float32),
        "w_pm": jax.random.normal(ks[3], (CLIP_DIM, SD), jnp.float32) * 0.05,
        "b_pm": jnp.zeros((SD,), jnp.float32),
        # latent average (as repeated to (n_styles, latent) in __load_latent_avg)
        "latent_avg": jax.random.normal(ks[4], (N_STYLES, LATENT), jnp.float32) * 0.1,
        # decoder synthesis (simplified stand-in for StyleGAN2 Generator)
        "w_syn": jax.random.normal(ks[5], (SD, pix), jnp.float32) * 0.05,
        "b_syn": jnp.zeros((pix,), jnp.float32),
    }


def make_fused_params(params):
    """Hoisted, one-time weight preprocessing (head concat + pool folding)."""
    # Concatenated e-side weights: [w_h | w_pm] -> (CLIP_DIM, 256)
    w_e_all = jnp.concatenate([params["w_h"], params["w_pm"]], axis=1)
    b_e_all = jnp.concatenate([params["b_h"], params["b_pm"]]).reshape(1, -1)
    # Concatenated h-side heads: [w_mu | w_lv] -> (HIDDEN, 384)
    w_ml = jnp.concatenate([params["w_mu"], params["w_lv"]], axis=1)
    b_ml = jnp.concatenate([params["b_mu"], params["b_lv"]]).reshape(1, -1)
    # latent_avg on the flat (1, SD) view (lane-denser than (1, S, 32))
    lat_flat = params["latent_avg"].reshape(1, SD)
    # Fold AdaptiveAvgPool2d into the synthesis weights/bias (pool is linear;
    # valid here because resize=True always applies the pool in this path).
    w_syn_pooled = params["w_syn"].reshape(
        SD, IMG_C, POOL_OUT, POOL_K, POOL_OUT, POOL_K).mean(axis=(3, 5)).reshape(SD, POOLED_PIX)
    b_syn_pooled = params["b_syn"].reshape(
        IMG_C, POOL_OUT, POOL_K, POOL_OUT, POOL_K).mean(axis=(2, 4)).reshape(1, POOLED_PIX)
    return {
        "w_e_all": w_e_all, "b_e_all": b_e_all,
        "w_ml": w_ml, "b_ml": b_ml,
        "latent_avg_flat": lat_flat,
        "w_syn_pooled": w_syn_pooled, "b_syn_pooled": b_syn_pooled,
    }


# ------------------------------------------------------------------
# t2s.forward  (input_code=False, img=None, resize=True, zero_var=True,
#               return_latents=True, start_from_latent_avg=True, learn_in_w=False)
# ------------------------------------------------------------------
@jax.jit
def t2s_forward(fused, e):
    img_flat, mu, log_var, prior_mu, codes_flat = pl.pallas_call(
        _t2s_fused_kernel,
        out_shape=(
            jax.ShapeDtypeStruct((B, POOLED_PIX), jnp.float32),  # pooled images (flat)
            jax.ShapeDtypeStruct((B, SD), jnp.float32),          # mu
            jax.ShapeDtypeStruct((B, SD), jnp.float32),          # log_var
            jax.ShapeDtypeStruct((B, SD), jnp.float32),          # prior_mu
            jax.ShapeDtypeStruct((B, SD), jnp.float32),          # result_latent (flat)
        ),
        in_specs=[pl.BlockSpec(memory_space=pltpu.MemorySpace.VMEM)] * 8,
        out_specs=[pl.BlockSpec(memory_space=pltpu.MemorySpace.VMEM)] * 5,
    )(e, fused["w_e_all"], fused["b_e_all"], fused["w_ml"], fused["b_ml"],
      fused["latent_avg_flat"], fused["w_syn_pooled"], fused["b_syn_pooled"])
    images = img_flat.reshape(B, IMG_C, POOL_OUT, POOL_OUT)          # NCHW (pooled)
    result_latent = codes_flat.reshape(B, N_STYLES, LATENT)
    return images, mu, log_var, prior_mu, result_latent


# ------------------------------------------------------------------
# Pure-JAX reference for verification (uses the raw, un-fused weights and
# pools AFTER synthesis, verifying the pool-folding is equivalent)
# ------------------------------------------------------------------
def t2s_forward_ref(params, e):
    h = e @ params["w_h"] + params["b_h"]
    h = jnp.where(h >= 0.0, h, 0.2 * h)
    mu = h @ params["w_mu"] + params["b_mu"]
    log_var = h @ params["w_lv"] + params["b_lv"]
    prior_mu = e @ params["w_pm"] + params["b_pm"]
    codes = mu.reshape(B, N_STYLES, LATENT) + params["latent_avg"][None]
    img = (codes.reshape(B, -1) @ params["w_syn"] + params["b_syn"]).reshape(
        B, IMG_C, OUTPUT_SIZE, OUTPUT_SIZE)
    pooled = img.reshape(B, IMG_C, POOL_OUT, POOL_K, POOL_OUT, POOL_K).mean(axis=(3, 5))
    return pooled, mu, log_var, prior_mu, codes


if __name__ == "__main__":
    key = jax.random.PRNGKey(0)
    pkey, ekey = jax.random.split(key)
    params = init_params(pkey)
    fused = make_fused_params(params)                       # hoisted, one-time
    e = jax.random.normal(ekey, (B, CLIP_DIM), jnp.float32)  # CLIP text embedding

    outs = jax.block_until_ready(t2s_forward(fused, e))
    refs = t2s_forward_ref(params, e)

    for o, r in zip(outs, refs):
        assert o.shape == r.shape, (o.shape, r.shape)
        assert jnp.allclose(o, r, atol=1e-4, rtol=1e-4), "mismatch vs reference"

    print("KERNEL_OK")
</pallas_src>

<mosaic_0001>
module attributes {stable_mosaic.version = 11 : i64} {
  func.func @_t2s_fused_kernel(%arg0: memref<2x64xf32, #tpu.memory_space<vmem>>, %arg1: memref<64x256xf32, #tpu.memory_space<vmem>>, %arg2: memref<1x256xf32, #tpu.memory_space<vmem>>, %arg3: memref<64x384xf32, #tpu.memory_space<vmem>>, %arg4: memref<1x384xf32, #tpu.memory_space<vmem>>, %arg5: memref<1x192xf32, #tpu.memory_space<vmem>>, %arg6: memref<192x192xf32, #tpu.memory_space<vmem>>, %arg7: memref<1x192xf32, #tpu.memory_space<vmem>>, %arg8: memref<2x192xf32, #tpu.memory_space<vmem>>, %arg9: memref<2x192xf32, #tpu.memory_space<vmem>>, %arg10: memref<2x192xf32, #tpu.memory_space<vmem>>, %arg11: memref<2x192xf32, #tpu.memory_space<vmem>>, %arg12: memref<2x192xf32, #tpu.memory_space<vmem>>) attributes {dimension_semantics = [], scalar_prefetch = 0 : i64, scratch_operands = 0 : i64, tpu.core_type = #tpu.core_type<tc>} {
    %c0 = arith.constant 0 : index
    %c0_0 = arith.constant 0 : index
    %0 = vector.load %arg0[%c0, %c0_0] : memref<2x64xf32, #tpu.memory_space<vmem>>, vector<2x64xf32>
    %c0_1 = arith.constant 0 : index
    %c0_2 = arith.constant 0 : index
    %1 = vector.load %arg1[%c0_1, %c0_2] : memref<64x256xf32, #tpu.memory_space<vmem>>, vector<64x256xf32>
    %cst = arith.constant dense<0.000000e+00> : vector<2x256xf32>
    %2 = tpu.matmul %0, %1, %cst {dimension_numbers = #tpu.dot_dimension_numbers<[1], [0], [0], [1], [0, 0, 1, 1], [], []>} : vector<2x64xf32>, vector<64x256xf32>, vector<2x256xf32> -> vector<2x256xf32>
    %c0_3 = arith.constant 0 : index
    %c0_4 = arith.constant 0 : index
    %3 = vector.load %arg2[%c0_3, %c0_4] : memref<1x256xf32, #tpu.memory_space<vmem>>, vector<1x256xf32>
    %4 = vector.broadcast %3 : vector<1x256xf32> to vector<2x256xf32>
    %5 = arith.addf %2, %4 : vector<2x256xf32>
    %6 = vector.extract_strided_slice %5 {offsets = [0, 0], sizes = [2, 64], strides = [1, 1]} : vector<2x256xf32> to vector<2x64xf32>
    %7 = vector.extract_strided_slice %5 {offsets = [0, 64], sizes = [2, 192], strides = [1, 1]} : vector<2x256xf32> to vector<2x192xf32>
    %cst_5 = arith.constant 0.000000e+00 : f32
    %8 = vector.broadcast %cst_5 : f32 to vector<2x64xf32>
    %9 = arith.cmpf oge, %6, %8 : vector<2x64xf32>
    %cst_6 = arith.constant 2.000000e-01 : f32
    %10 = vector.broadcast %cst_6 : f32 to vector<2x64xf32>
    %11 = arith.mulf %10, %6 : vector<2x64xf32>
    %12 = arith.select %9, %6, %11 : vector<2x64xi1>, vector<2x64xf32>
    %c0_7 = arith.constant 0 : index
    %c0_8 = arith.constant 0 : index
    %13 = vector.load %arg3[%c0_7, %c0_8] : memref<64x384xf32, #tpu.memory_space<vmem>>, vector<64x384xf32>
    %cst_9 = arith.constant dense<0.000000e+00> : vector<2x384xf32>
    %14 = tpu.matmul %12, %13, %cst_9 {dimension_numbers = #tpu.dot_dimension_numbers<[1], [0], [0], [1], [0, 0, 1, 1], [], []>} : vector<2x64xf32>, vector<64x384xf32>, vector<2x384xf32> -> vector<2x384xf32>
    %c0_10 = arith.constant 0 : index
    %c0_11 = arith.constant 0 : index
    %15 = vector.load %arg4[%c0_10, %c0_11] : memref<1x384xf32, #tpu.memory_space<vmem>>, vector<1x384xf32>
    %16 = vector.broadcast %15 : vector<1x384xf32> to vector<2x384xf32>
    %17 = arith.addf %14, %16 : vector<2x384xf32>
    %18 = vector.extract_strided_slice %17 {offsets = [0, 0], sizes = [2, 192], strides = [1, 1]} : vector<2x384xf32> to vector<2x192xf32>
    %19 = vector.extract_strided_slice %17 {offsets = [0, 192], sizes = [2, 192], strides = [1, 1]} : vector<2x384xf32> to vector<2x192xf32>
    %c0_12 = arith.constant 0 : index
    %c0_13 = arith.constant 0 : index
    %20 = vector.load %arg5[%c0_12, %c0_13] : memref<1x192xf32, #tpu.memory_space<vmem>>, vector<1x192xf32>
    %21 = vector.broadcast %20 : vector<1x192xf32> to vector<2x192xf32>
    %22 = arith.addf %18, %21 : vector<2x192xf32>
    %c0_14 = arith.constant 0 : index
    %c0_15 = arith.constant 0 : index
    %23 = vector.load %arg6[%c0_14, %c0_15] : memref<192x192xf32, #tpu.memory_space<vmem>>, vector<192x192xf32>
    %cst_16 = arith.constant dense<0.000000e+00> : vector<2x192xf32>
    %24 = tpu.matmul %22, %23, %cst_16 {dimension_numbers = #tpu.dot_dimension_numbers<[1], [0], [0], [1], [0, 0, 1, 1], [], []>} : vector<2x192xf32>, vector<192x192xf32>, vector<2x192xf32> -> vector<2x192xf32>
    %c0_17 = arith.constant 0 : index
    %c0_18 = arith.constant 0 : index
    %25 = vector.load %arg7[%c0_17, %c0_18] : memref<1x192xf32, #tpu.memory_space<vmem>>, vector<1x192xf32>
    %26 = vector.broadcast %25 : vector<1x192xf32> to vector<2x192xf32>
    %27 = arith.addf %24, %26 : vector<2x192xf32>
    %c0_19 = arith.constant 0 : index
    %c0_20 = arith.constant 0 : index
    %28 = vector.load %arg8[%c0_19, %c0_20] : memref<2x192xf32, #tpu.memory_space<vmem>>, vector<2x192xf32>
    tpu.vector_store %arg8[%c0_19, %c0_20], %27 {strides = array<i32>} : memref<2x192xf32, #tpu.memory_space<vmem>>, vector<2x192xf32>,
    %c0_21 = arith.constant 0 : index
    %c0_22 = arith.constant 0 : index
    %29 = vector.load %arg9[%c0_21, %c0_22] : memref<2x192xf32, #tpu.memory_space<vmem>>, vector<2x192xf32>
    tpu.vector_store %arg9[%c0_21, %c0_22], %18 {strides = array<i32>} : memref<2x192xf32, #tpu.memory_space<vmem>>, vector<2x192xf32>,
    %c0_23 = arith.constant 0 : index
    %c0_24 = arith.constant 0 : index
    %30 = vector.load %arg10[%c0_23, %c0_24] : memref<2x192xf32, #tpu.memory_space<vmem>>, vector<2x192xf32>
    tpu.vector_store %arg10[%c0_23, %c0_24], %19 {strides = array<i32>} : memref<2x192xf32, #tpu.memory_space<vmem>>, vector<2x192xf32>,
    %c0_25 = arith.constant 0 : index
    %c0_26 = arith.constant 0 : index
    %31 = vector.load %arg11[%c0_25, %c0_26] : memref<2x192xf32, #tpu.memory_space<vmem>>, vector<2x192xf32>
    tpu.vector_store %arg11[%c0_25, %c0_26], %7 {strides = array<i32>} : memref<2x192xf32, #tpu.memory_space<vmem>>, vector<2x192xf32>,
    %c0_27 = arith.constant 0 : index
    %c0_28 = arith.constant 0 : index
    %32 = vector.load %arg12[%c0_27, %c0_28] : memref<2x192xf32, #tpu.memory_space<vmem>>, vector<2x192xf32>
    tpu.vector_store %arg12[%c0_27, %c0_28], %22 {strides = array<i32>} : memref<2x192xf32, #tpu.memory_space<vmem>>, vector<2x192xf32>,
    return
  }
}

</mosaic_0001>

<bundles_post_ra>
// kernel: t2s_forward.1
= control target key start
LH: loop header
LB: loop body
LE: loop exit
PB: predicated region body
PF: predicated region fallthrough
CT: control target
= control target key end

     0   :  { %18 = vsyncpa [#allocation3], 0  ;;  %s1245_s0 = inlined_call_operand.vmem [shape: f32[2,64], index: 0, kind: input, shape index: {}]   ;;  %s1246_s1 = inlined_call_operand.hbm [shape: f32[64,256], index: 1, kind: input, shape index: {}]   ;;  %s1247_s2 = inlined_call_operand.hbm [shape: f32[1,256], index: 2, kind: input, shape index: {}]   ;;  %s1248_s3 = inlined_call_operand.hbm [shape: f32[64,384], index: 3, kind: input, shape index: {}]   ;;  %s1249_s4 = inlined_call_operand.vmem [shape: f32[1,384], index: 4, kind: input, shape index: {}]   ;;  %s1250_s5 = inlined_call_operand.vmem [shape: f32[1,192], index: 5, kind: input, shape index: {}]   ;;  %s1251_s6 = inlined_call_operand.hbm [shape: f32[192,192], index: 6, kind: input, shape index: {}]   ;;  %s1252_s7 = inlined_call_operand.hbm [shape: f32[1,192], index: 7, kind: input, shape index: {}]   ;;  %s1253_s8 = inlined_call_operand.vmem [shape: f32[2,192], index: 8, kind: output, shape index: {0}]   ;;  %s1254_s9 = inlined_call_operand.hbm [shape: f32[2,192], index: 9, kind: output, shape index: {1}]   ;;  %s1255_s10 = inlined_call_operand.hbm [shape: f32[2,192], index: 10, kind: output, shape index: {2}]   ;;  %s1256_s11 = inlined_call_operand.hbm [shape: f32[2,192], index: 11, kind: output, shape index: {3}]   ;;  %s1257_s12 = inlined_call_operand.vmem [shape: f32[2,192], index: 12, kind: output, shape index: {4}]  }
   0x1   :  { %19 = vsyncpa [#allocation6], 0 }
   0x2   :  { %20 = vsyncpa [#allocation9], 0 }
   0x3   :  { %21 = vsyncpa [#allocation4], 0 }
   0x4   :  { %22 = vsyncpa [#allocation13], 0  ;;  %s988_s21 = smov [#allocation5]   ;;  %s802_s25 = scalar_lea.hbm %s1247_s2, 32 }
   0x5   :  { %s43_s22 = sshll.u32 %s988_s21, 4  ;;  %p803_p0 = scmp.ne.s32.totalorder %s1247_s2, %s802_s25  ;;  %s44_s22 = int_to_ptr.vmem [resolvable:$true] %s43_s22 }
   0x6   :  { %p806_p1 = scmp.lt.u32.totalorder %s802_s25, %s1247_s2 }
   0x8   :  { %p808_p2 = pnand %p806_p1, %p803_p0 }
   0xa   :  { %811 = shalt.err (!%p808_p2)
}
   0xb   :  { %s812_s30 = scalar_lea.vmem %s44_s22, 32  ;;  %p817_p4 = scmp.lt.s32.totalorder %s44_s22, %s44_s22 }
   0xc   :  { %p813_p3 = scmp.ne.s32.totalorder %s44_s22, %s812_s30  ;;  %p818_p5 = scmp.lt.s32.totalorder %s812_s30, %s812_s30 }
   0xe   :  { %p819_p6 = por %p818_p5, %p817_p4 }
  0x10   :  { %p820_p7 = pnand %p819_p6, %p813_p3 }
  0x12   :  { %823 = shalt.err (!%p820_p7)
}
  0x13   :  { %46 = dma.hbm_to_vmem [thread:$0]  %s1247_s2, 32, %s44_s22, [#allocation6]  }
  0x14   :  { %s989_s15 = smov [#allocation8]   ;;  %s990_s17 = smov [#allocation2]  }
  0x15   :  { %s68_s16 = sshll.u32 %s989_s15, 4  ;;  %s30_s18 = sshll.u32 %s990_s17, 4  ;;  %s69_s16 = int_to_ptr.vmem [resolvable:$true] %s68_s16  ;;  %s31_s18 = int_to_ptr.vmem [resolvable:$true] %s30_s18 }
  0x16   :  { %s824_s21 = scalar_lea.hbm %s1251_s6, 6144 }
  0x17   :  { %p825_p8 = scmp.ne.s32.totalorder %s1251_s6, %s824_s21  ;;  %p828_p9 = scmp.lt.u32.totalorder %s824_s21, %s1251_s6 }
  0x19   :  { %p830_p10 = pnand %p828_p9, %p825_p8 }
  0x1b   :  { %833 = shalt.err (!%p830_p10)
}
  0x1c   :  { %s834_s2 = scalar_lea.vmem %s69_s16, 6144  ;;  %p839_p12 = scmp.lt.s32.totalorder %s69_s16, %s69_s16 }
  0x1d   :  { %p835_p11 = scmp.ne.s32.totalorder %s69_s16, %s834_s2  ;;  %p840_p13 = scmp.lt.s32.totalorder %s834_s2, %s834_s2 }
  0x1f   :  { %p841_p0 = por %p840_p13, %p839_p12 }
  0x21   :  { %p842_p1 = pnand %p841_p0, %p835_p11 }
  0x23   :  { %845 = shalt.err (!%p842_p1)
}
  0x24   :  { %s991_s22 = smov 256   ;;  %s992_s27 = smov 16  }
  0x25   :  { %74 = dma.hbm_to_vmem [thread:$0]  %s1251_s6, 6144, %s69_s16, [#allocation9], %s991_s22, %s991_s22, %s992_s27  }
  0x26   :  { %s846_s14 = scalar_lea.hbm %s1246_s1, 2048 }
  0x27   :  { %p847_p2 = scmp.ne.s32.totalorder %s1246_s1, %s846_s14  ;;  %p850_p3 = scmp.lt.u32.totalorder %s846_s14, %s1246_s1 }
  0x29   :  { %p852_p4 = pnand %p850_p3, %p847_p2 }
  0x2b   :  { %855 = shalt.err (!%p852_p4)
}
  0x2c   :  { %s856_s21 = scalar_lea.vmem %s31_s18, 2048  ;;  %p861_p6 = scmp.lt.s32.totalorder %s31_s18, %s31_s18 }
  0x2d   :  { %p857_p5 = scmp.ne.s32.totalorder %s31_s18, %s856_s21  ;;  %p862_p7 = scmp.lt.s32.totalorder %s856_s21, %s856_s21 }
  0x2f   :  { %p863_p8 = por %p862_p7, %p861_p6 }
  0x31   :  { %p864_p9 = pnand %p863_p8, %p857_p5 }
  0x33   :  { %867 = shalt.err (!%p864_p9)
}
  0x34   :  { %36 = dma.hbm_to_vmem [thread:$0]  %s1246_s1, 2048, %s31_s18, [#allocation3], %s991_s22, %s991_s22, %s992_s27  }
  0x35   :  { %s993_s23 = smov [#allocation7]   ;;  %s868_s2 = scalar_lea.hbm %s1248_s3, 3072 }
  0x36   :  { %s52_s24 = sshll.u32 %s993_s23, 4  ;;  %p869_p10 = scmp.ne.s32.totalorder %s1248_s3, %s868_s2  ;;  %s53_s24 = int_to_ptr.vmem [resolvable:$true] %s52_s24 }
  0x37   :  { %p872_p11 = scmp.lt.u32.totalorder %s868_s2, %s1248_s3 }
  0x39   :  { %p874_p12 = pnand %p872_p11, %p869_p10 }
  0x3b   :  { %877 = shalt.err (!%p874_p12)
}
  0x3c   :  { %s878_s14 = scalar_lea.vmem %s53_s24, 3072  ;;  %p883_p0 = scmp.lt.s32.totalorder %s53_s24, %s53_s24 }
  0x3d   :  { %p879_p13 = scmp.ne.s32.totalorder %s53_s24, %s878_s14  ;;  %p884_p1 = scmp.lt.s32.totalorder %s878_s14, %s878_s14 }
  0x3f   :  { %p885_p2 = por %p884_p1, %p883_p0 }
  0x41   :  { %p886_p3 = pnand %p885_p2, %p879_p13 }
  0x43   :  { %889 = shalt.err (!%p886_p3)
}
  0x44   :  { %s994_s1 = smov 384   ;;  %s995_s18 = smov 24  }
  0x45   :  { %58 = dma.hbm_to_vmem [thread:$0]  %s1248_s3, 3072, %s53_s24, [#allocation6], %s994_s1, %s994_s1, %s995_s18  }
  0x46   :  { %s996_s15 = smov [#allocation10]   ;;  %s890_s21 = scalar_lea.hbm %s1252_s7, 32 }
  0x47   :  { %s81_s17 = sshll.u32 %s996_s15, 4  ;;  %p891_p4 = scmp.ne.s32.totalorder %s1252_s7, %s890_s21  ;;  %s82_s17 = int_to_ptr.vmem [resolvable:$true] %s81_s17 }
  0x48   :  { %p894_p5 = scmp.lt.u32.totalorder %s890_s21, %s1252_s7 }
  0x4a   :  { %p896_p6 = pnand %p894_p5, %p891_p4 }
  0x4c   :  { %899 = shalt.err (!%p896_p6)
}
  0x4d   :  { %s900_s26 = scalar_lea.vmem %s82_s17, 32  ;;  %p905_p8 = scmp.lt.s32.totalorder %s82_s17, %s82_s17 }
  0x4e   :  { %p901_p7 = scmp.ne.s32.totalorder %s82_s17, %s900_s26  ;;  %p906_p9 = scmp.lt.s32.totalorder %s900_s26, %s900_s26 }
  0x50   :  { %p907_p10 = por %p906_p9, %p905_p8 }
  0x52   :  { %p908_p11 = pnand %p907_p10, %p901_p7 }
  0x54   :  { %911 = shalt.err (!%p908_p11)
}
  0x55   :  { %84 = dma.hbm_to_vmem [thread:$0]  %s1252_s7, 32, %s82_s17, [#allocation9]  }
  0x56   :  { %978 = dma.done.wait [#allocation3], 2048  }
  0x57   :  { %979 = vsyncadd [#allocation3], 4294965248 }
  0x58   :  { %980 = dma.done.wait [#allocation6], 3104  }
  0x59   :  { %981 = vsyncadd [#allocation6], 4294964192 }
  0x5a   :  { %982 = dma.done.wait [#allocation9], 6176  }
  0x5b   :  { %983 = vsyncadd [#allocation9], 4294961120  ;;  %v997_v0 = vmov 0.0   ;;  %v102_v1 = vld [vmem:[#allocation2 + $0x8] sm:$0xff]  ;;  %v104_v2 = vld [vmem:[#allocation2 + $0x18] sm:$0xff]  ;;  %vm129_vm0 = vcmask 523264  }
  0x5c   :  { %197 = vmatprep.mubr.f32.mxu0 %v997_v0  ;;  %v101_v3 = vld [vmem:[#allocation2] sm:$0xff]  ;;  %v693_v4 = vpack.c.bf16 %v104_v2, %v102_v1  ;;  %v103_v5 = vld [vmem:[#allocation2 + $0x10] sm:$0xff]  ;;  %v106_v6 = vld [vmem:[#allocation2 + $0x28] sm:$0xff]  ;;  %v998_v50 = vmov 0.0|0.0   ;;  %vm999_vm2 = vmmov 0   ;;  %vm551_vm3 = vcmask 1041408  }
  0x5d   :  { %v108_v7 = vld [vmem:[#allocation2 + $0x38] sm:$0xff]  ;;  %v695_v8 = vpack.c.bf16 %v103_v5, %v101_v3  ;;  %v105_v10 = vld [vmem:[#allocation2 + $0x20] sm:$0xff]  ;;  %v107_v11 = vld [vmem:[#allocation2 + $0x30] sm:$0xff]  ;;  %vm552_vm4 = vcmask 519170   ;;  %s1001_s13 = smov 64   ;;  %s1002_s14 = smov [#allocation11]  }
  0x5e   :  { %v697_v9 = vpack.c.bf16 %v108_v7, %v106_v6  ;;  %v110_v12 = vld [vmem:[#allocation2 + $0x48] sm:$0xff]  ;;  %694 = vmatprep.subr.bf16.mxu0 %v693_v4  ;;  %v112_v13 = vld [vmem:[#allocation2 + $0x58] sm:$0xff]  ;;  %v699_v14 = vpack.c.bf16 %v107_v11, %v105_v10  ;;  %v109_v16 = vld [vmem:[#allocation2 + $0x40] sm:$0xff]  ;;  %s617_s1 = sshll.u32 %s1002_s14, 4  ;;  %s618_s1 = int_to_ptr.vmem [resolvable:$true] %s617_s1 }
  0x5f   :  { %696 = vmatpush1.bf16.msra.mxu0 %v695_v8  ;;  %v701_v15 = vpack.c.bf16 %v112_v13, %v110_v12  ;;  %v111_v17 = vld [vmem:[#allocation2 + $0x50] sm:$0xff]  ;;  %v114_v18 = vld [vmem:[#allocation2 + $0x68] sm:$0xff]  ;;  %v116_v19 = vld [vmem:[#allocation2 + $0x78] sm:$0xff]  ;;  %s912_s18 = scalar_lea.vmem %s618_s1, 64  ;;  %p917_p13 = scmp.lt.s32.totalorder %s618_s1, %s618_s1 }
  0x60   :  { %698 = vmatprep.subr.bf16.mxu0 %v697_v9  ;;  %v703_v20 = vpack.c.bf16 %v111_v17, %v109_v16  ;;  %v705_v21 = vpack.c.bf16 %v116_v19, %v114_v18  ;;  %v113_v22 = vld [vmem:[#allocation2 + $0x60] sm:$0xff]  ;;  %v115_v23 = vld [vmem:[#allocation2 + $0x70] sm:$0xff]  ;;  %vm1175_vm5 = vmor %vm552_vm4, %vm551_vm3  ;;  %p913_p12 = scmp.ne.s32.totalorder %s618_s1, %s912_s18  ;;  %p918_p0 = scmp.lt.s32.totalorder %s912_s18, %s912_s18 }
  0x61   :  { %v208_v24 = vld [vmem:[#allocation7 + $0x8] sm:$0xff]  ;;  %v211_v25 = vld [vmem:[#allocation7 + $0x20] sm:$0xff]  ;;  %v707_v26 = vpack.c.bf16 %v115_v23, %v113_v22  ;;  %v210_v29 = vld [vmem:[#allocation7 + $0x18] sm:$0xff] }
  0x62   :  { %v709_v27 = vpack.c.bf16 %v211_v25, %v208_v24  ;;  %v207_v28 = vld [vmem:[#allocation7] sm:$0xff]  ;;  %v214_v30 = vld [vmem:[#allocation7 + $0x38] sm:$0xff]  ;;  %v217_v31 = vld [vmem:[#allocation7 + $0x50] sm:$0xff]  ;;  %p919_p1 = por %p918_p0, %p917_p13 }
  0x63   :  { %700 = vmatpush1.bf16.msra.mxu0 %v699_v14  ;;  %v100_v32 = vld [vmem:[%s1245_s0] sm:$0x3]  ;;  %v711_v33 = vpack.c.bf16 %v210_v29, %v207_v28  ;;  %v713_v34 = vpack.c.bf16 %v217_v31, %v214_v30  ;;  %v213_v35 = vld [vmem:[#allocation7 + $0x30] sm:$0xff]  ;;  %v223_v38 = vld [vmem:[#allocation7 + $0x80] sm:$0xff] }
  0x64   :  { %702 = vmatprep.subr.bf16.mxu0 %v701_v15  ;;  %v216_v36 = vld [vmem:[#allocation7 + $0x48] sm:$0xff]  ;;  %v219_v41 = vld [vmem:[#allocation7 + $0x60] sm:$0xff]  ;;  %v222_v42 = vld [vmem:[#allocation7 + $0x78] sm:$0xff]  ;;  %p920_p2 = pnand %p919_p1, %p913_p12 }
  0x65   :  { %v220_v37 = vld [vmem:[#allocation7 + $0x68] sm:$0xff]  ;;  %v715_v39 = vpack.c.bf16 %v216_v36, %v213_v35  ;;  %v719_v43 = vpack.c.bf16 %v222_v42, %v219_v41  ;;  %v226_v44 = vld [vmem:[#allocation7 + $0x98] sm:$0xff]  ;;  %v229_v45 = vld [vmem:[#allocation7 + $0xb0] sm:$0xff] }
  0x66   :  { %v717_v40 = vpack.c.bf16 %v223_v38, %v220_v37  ;;  %v721_v46 = vpack.c.bf16 %v229_v45, %v226_v44  ;;  %v225_v47 = vld [vmem:[#allocation7 + $0x90] sm:$0xff]  ;;  %v228_v48 = vld [vmem:[#allocation7 + $0xa8] sm:$0xff]  ;;  %v409_v52 = vld [vmem:[#allocation8 + $0x18] sm:$0xff] }
  0x67   :  { %704 = vmatpush1.bf16.msra.mxu0 %v703_v20  ;;  %v723_v49 = vpack.c.bf16 %v228_v48, %v225_v47  ;;  %v407_v51 = vld [vmem:[#allocation8 + $0x8] sm:$0xff]  ;;  %v406_v53 = vld [vmem:[#allocation8] sm:$0xff]  ;;  %v408_v55 = vld [vmem:[#allocation8 + $0x10] sm:$0xff] }
  0x68   :  { %706 = vmatprep.subr.bf16.mxu0 %v705_v21  ;;  %v737_v54 = vpack.c.bf16 %v409_v52, %v407_v51  ;;  %v411_v56 = vld [vmem:[#allocation8 + $0x28] sm:$0xff]  ;;  %v413_v57 = vld [vmem:[#allocation8 + $0x38] sm:$0xff]  ;;  %v739_v58 = vpack.c.bf16 %v408_v55, %v406_v53  ;;  %v410_v60 = vld [vmem:[#allocation8 + $0x20] sm:$0xff]  ;;  %v119_v52 = vlaneseq }
  0x69   :  { %v741_v59 = vpack.c.bf16 %v413_v57, %v411_v56  ;;  %v412_v61 = vld [vmem:[#allocation8 + $0x30] sm:$0xff]  ;;  %v415_v62 = vld [vmem:[#allocation8 + $0x48] sm:$0xff]  ;;  %v417_v63 = vld [vmem:[#allocation8 + $0x58] sm:$0xff] }
  0x6a   :  { %738 = vmatprep.subr.bf16.mxu1 %v737_v54  ;;  %v743_v1 = vpack.c.bf16 %v412_v61, %v410_v60  ;;  %v745_v2 = vpack.c.bf16 %v417_v63, %v415_v62  ;;  %v414_v3 = vld [vmem:[#allocation8 + $0x40] sm:$0xff]  ;;  %v416_v4 = vld [vmem:[#allocation8 + $0x50] sm:$0xff]  ;;  %v419_v5 = vld [vmem:[#allocation8 + $0x68] sm:$0xff]  ;;  %v1137_v53 = vshrl.u32 %v119_v52, 7 }
  0x6b   :  { %708 = vmatpush1.bf16.msra.mxu0 %v707_v26  ;;  %740 = vmatpush1.bf16.msra.mxu1 %v739_v58  ;;  %v421_v6 = vld [vmem:[#allocation8 + $0x78] sm:$0xff]  ;;  %v747_v7 = vpack.c.bf16 %v416_v4, %v414_v3  ;;  %v418_v9 = vld [vmem:[#allocation8 + $0x60] sm:$0xff]  ;;  %v420_v10 = vld [vmem:[#allocation8 + $0x70] sm:$0xff] }
  0x6c   :  { %710 = vmatprep.subr.bf16.mxu0 %v709_v27  ;;  %742 = vmatprep.subr.bf16.mxu1 %v741_v59  ;;  %v749_v8 = vpack.c.bf16 %v421_v6, %v419_v5  ;;  %v423_v11 = vld [vmem:[#allocation8 + $0x88] sm:$0xff]  ;;  %v425_v12 = vld [vmem:[#allocation8 + $0x98] sm:$0xff]  ;;  %v751_v13 = vpack.c.bf16 %v420_v10, %v418_v9  ;;  %v422_v15 = vld [vmem:[#allocation8 + $0x80] sm:$0xff]  ;;  %v1140_v54 = vsub.s32 0, %v1137_v53  ;;  %v1143_v56 = vsub.s32 1, %v1137_v53 }
  0x6d   :  { %v753_v14 = vpack.c.bf16 %v425_v12, %v423_v11  ;;  %v424_v16 = vld [vmem:[#allocation8 + $0x90] sm:$0xff]  ;;  %v427_v17 = vld [vmem:[#allocation8 + $0xa8] sm:$0xff]  ;;  %v429_v18 = vld [vmem:[#allocation8 + $0xb8] sm:$0xff] }
  0x6e   :  { %661 = vmatmul.mubr.msk.f32.vlgmr.msra.gmra.mrb[0].mxu0 %vm129_vm0, %v100_v32  ;;  %v755_v19 = vpack.c.bf16 %v424_v16, %v422_v15  ;;  %v757_v20 = vpack.c.bf16 %v429_v18, %v427_v17  ;;  %v426_v21 = vld [vmem:[#allocation8 + $0xa0] sm:$0xff]  ;;  %v428_v22 = vld [vmem:[#allocation8 + $0xb0] sm:$0xff]  ;;  %v431_v23 = vld [vmem:[#allocation8 + $0xc8] sm:$0xff] }
  0x6f   :  { %712 = vmatpush1.bf16.msra.mxu0 %v711_v33  ;;  %315 = vmatprep.mubr.f32.mxu0 %v997_v0  ;;  %v433_v24 = vld [vmem:[#allocation8 + $0xd8] sm:$0xff]  ;;  %v759_v25 = vpack.c.bf16 %v428_v22, %v426_v21  ;;  %v430_v27 = vld [vmem:[#allocation8 + $0xc0] sm:$0xff]  ;;  %v432_v28 = vld [vmem:[#allocation8 + $0xd0] sm:$0xff] }
  0x70   :  { %714 = vmatprep.subr.bf16.mxu0 %v713_v34  ;;  %744 = vmatpush1.bf16.msra.mxu1 %v743_v1  ;;  %v761_v26 = vpack.c.bf16 %v433_v24, %v431_v23  ;;  %v435_v29 = vld [vmem:[#allocation8 + $0xe8] sm:$0xff]  ;;  %v437_v30 = vld [vmem:[#allocation8 + $0xf8] sm:$0xff]  ;;  %v763_v31 = vpack.c.bf16 %v432_v28, %v430_v27  ;;  %v434_v33 = vld [vmem:[#allocation8 + $0xe0] sm:$0xff]  ;;  %v1000_v24 = vmov 1983009808  }
  0x71   :  { %746 = vmatprep.subr.bf16.mxu1 %v745_v2  ;;  %v765_v32 = vpack.c.bf16 %v437_v30, %v435_v29  ;;  %v436_v34 = vld [vmem:[#allocation8 + $0xf0] sm:$0xff]  ;;  %v439_v35 = vld [vmem:[#allocation8 + $0x108] sm:$0xff]  ;;  %v441_v36 = vld [vmem:[#allocation8 + $0x118] sm:$0xff] }
  0x72   :  { %v767_v37 = vpack.c.bf16 %v436_v34, %v434_v33  ;;  %v769_v38 = vpack.c.bf16 %v441_v36, %v439_v35  ;;  %v443_v41 = vld [vmem:[#allocation8 + $0x128] sm:$0xff]  ;;  %v445_v42 = vld [vmem:[#allocation8 + $0x138] sm:$0xff]  ;;  %v442_v45 = vld [vmem:[#allocation8 + $0x120] sm:$0xff] }
  0x73   :  { %716 = vmatpush1.bf16.msra.mxu0 %v715_v39  ;;  %v438_v39 = vld [vmem:[#allocation8 + $0x100] sm:$0xff]  ;;  %v773_v44 = vpack.c.bf16 %v445_v42, %v443_v41  ;;  %v447_v47 = vld [vmem:[#allocation8 + $0x148] sm:$0xff]  ;;  %v449_v48 = vld [vmem:[#allocation8 + $0x158] sm:$0xff] }
  0x74   :  { %718 = vmatprep.subr.bf16.mxu0 %v717_v40  ;;  %748 = vmatpush1.bf16.msra.mxu1 %v747_v7  ;;  %v440_v40 = vld [vmem:[#allocation8 + $0x110] sm:$0xff]  ;;  %v777_v51 = vpack.c.bf16 %v449_v48, %v447_v47  ;;  %v117_v55 = vld [vmem:[#allocation5] sm:$0x3]  ;;  %v212_v61 = vld [vmem:[#allocation7 + $0x28] sm:$0xff] }
  0x75   :  { %750 = vmatprep.subr.bf16.mxu1 %v749_v8  ;;  %v122_v57 = vrot.slane %v117_v55, %v1140_v54  ;;  %v126_v58 = vrot.slane %v117_v55, %v1143_v56  ;;  %v209_v60 = vld [vmem:[#allocation7 + $0x10] sm:$0xff]  ;;  %v215_v5 = vld [vmem:[#allocation7 + $0x40] sm:$0xff]  ;;  %v218_v6 = vld [vmem:[#allocation7 + $0x58] sm:$0xff] }
  0x76   :  { %v726_v3 = vpack.c.bf16 %v212_v61, %v209_v60  ;;  %v729_v8 = vpack.c.bf16 %v218_v6, %v215_v5  ;;  %v221_v9 = vld [vmem:[#allocation7 + $0x70] sm:$0xff]  ;;  %v224_v10 = vld [vmem:[#allocation7 + $0x88] sm:$0xff]  ;;  %v227_v12 = vld [vmem:[#allocation7 + $0xa0] sm:$0xff] }
  0x77   :  { %720 = vmatpush1.bf16.msra.mxu0 %v719_v43  ;;  %v771_v43 = vpack.c.bf16 %v440_v40, %v438_v39  ;;  %v732_v11 = vpack.c.bf16 %v224_v10, %v221_v9  ;;  %v446_v15 = vld [vmem:[#allocation8 + $0x140] sm:$0xff]  ;;  %v448_v16 = vld [vmem:[#allocation8 + $0x150] sm:$0xff]  ;;  %v451_v17 = vld [vmem:[#allocation8 + $0x168] sm:$0xff] }
  0x78   :  { %722 = vmatprep.subr.bf16.mxu0 %v721_v46  ;;  %752 = vmatpush1.bf16.msra.mxu1 %v751_v13  ;;  %v444_v46 = vld [vmem:[#allocation8 + $0x130] sm:$0xff]  ;;  %v230_v13 = vld [vmem:[#allocation7 + $0xb8] sm:$0xff] }
  0x79   :  { %754 = vmatprep.subr.bf16.mxu1 %v753_v14  ;;  %v735_v14 = vpack.c.bf16 %v230_v13, %v227_v12  ;;  %v453_v18 = vld [vmem:[#allocation8 + $0x178] sm:$0xff]  ;;  %v452_v21 = vld [vmem:[#allocation8 + $0x170] sm:$0xff] }
  0x7a   :  { %v231_v23 = vld [vmem:[%s1249_s4] sm:$0x7] }
  0x7b   :  { %724 = vmatpush1.bf16.msra.mxu0 %v723_v49  ;;  %v775_v49 = vpack.c.bf16 %v444_v46, %v442_v45  ;;  %v240_v27 = vrot.slane %v231_v23, %v1143_v56 }
  0x7c   :  { %725 = vmatprep.subr.bf16.mxu0 %v998_v50  ;;  %756 = vmatpush1.bf16.msra.mxu1 %v755_v19  ;;  %v781_v19 = vpack.c.bf16 %v453_v18, %v451_v17 }
  0x7d   :  { %758 = vmatprep.subr.bf16.mxu1 %v757_v20  ;;  %v450_v20 = vld [vmem:[#allocation8 + $0x160] sm:$0xff] }
  0x7e   :  { %v783_v22 = vpack.c.bf16 %v452_v21, %v450_v20 }
  0x80   :  { %760 = vmatpush1.bf16.msra.mxu1 %v759_v25  ;;  %v544_v25 = vunpack.c.l.s4 %v1000_v24 }
  0x81   :  { %762 = vmatprep.subr.bf16.mxu1 %v761_v26  ;;  %v236_v26 = vrot.slane %v231_v23, %v1140_v54 }
  0x84   :  { %764 = vmatpush1.bf16.msra.mxu1 %v763_v31  ;;  %v545_v31 = vunpack.c.0.s8 %v544_v25 }
  0x85   :  { %766 = vmatprep.subr.bf16.mxu1 %v765_v32 }
  0x88   :  { %768 = vmatpush1.bf16.msra.mxu1 %v767_v37 }
  0x89   :  { %770 = vmatprep.subr.bf16.mxu1 %v769_v38  ;;  %v1173_v38 = vsub.s32 %v545_v31, %v1137_v53 }
  0x8c   :  { %772 = vmatpush1.bf16.msra.mxu1 %v771_v43  ;;  %v243_v43 = vsub.s32 2, %v1137_v53 }
  0x8d   :  { %774 = vmatprep.subr.bf16.mxu1 %v773_v44 }
  0x8e   :  { %v244_v44 = vrot.slane %v231_v23, %v243_v43 }
  0x90   :  { %776 = vmatpush1.bf16.msra.mxu1 %v775_v49 }
  0x91   :  { %778 = vmatprep.subr.bf16.mxu1 %v777_v51 }
 0x141   :  { %v199_v59 = vpop.f32.mrb[0].mxu0 }
 0x142   :  { %v1147_v62 = vadd.f32 %v199_v59, %v122_v57  ;;  %v201_v63 = vpop.f32.mrb[1].mxu0 }
 0x143   :  { %v1149_v1 = vadd.f32 %v201_v63, %v126_v58 }
 0x144   :  { %v205_v2 = vmul.f32 0.2, %v1147_v62  ;;  %vm204_vm1 = vcmp.ge.f32.partialorder %v1147_v62, 0.0 }
 0x145   :  { %v584_v4 = vcombine.low %v1147_v62, %v1149_v1 }
 0x146   :  { %v206_v7 = vsel %vm204_vm1, %v1147_v62, %v205_v2 }
 0x147   :  { %662 = vmatmul.mubr.msk.f32.vlgmr.msra.gmra.mrb[2].mxu0 %vm129_vm0, %v206_v7  ;;  %v591_v51 = vrot.slane %v584_v4, %v1173_v38 }
 0x148   :  { %727 = vmatpush3.bf16.msra.mxu0 %v726_v3  ;;  %690 = vmatprep.mubr.msk.f32.mxu0 %vm999_vm2, %v997_v0  ;;  %v779_v0 = vpack.c.bf16 %v448_v16, %v446_v15 }
 0x149   :  { %728 = vmatprep.subr.bf16.mxu0 %v998_v50 }
 0x14a   :  { %780 = vmatpush1.bf16.msra.mxu1 %v779_v0 }
 0x14b   :  { %782 = vmatprep.subr.bf16.mxu1 %v781_v19 }
 0x14c   :  { %730 = vmatpush3.bf16.msra.mxu0 %v729_v8 }
 0x14d   :  { %731 = vmatprep.subr.bf16.mxu0 %v998_v50 }
 0x14e   :  { %784 = vmatpush1.bf16.msra.mxu1 %v783_v22 }
 0x150   :  { %733 = vmatpush3.bf16.msra.mxu0 %v732_v11 }
 0x151   :  { %734 = vmatprep.subr.bf16.mxu0 %v998_v50  ;;  %v392_v50 = vld [vmem:[%s1250_s5] sm:$0x3] }
 0x152   :  { %v397_v28 = vrot.slane %v392_v50, %v1140_v54  ;;  %v401_v30 = vrot.slane %v392_v50, %v1143_v56 }
 0x154   :  { %736 = vmatpush3.bf16.msra.mxu0 %v735_v14 }
 0x157   :  { %691 = vmatmul.mubr.msk.f32.vlgmr.msra.gmra.mrb[4].mxu0 %vm129_vm0, %v206_v7 }
 0x21a   :  { %v317_v29 = vpop.f32.mrb[2].mxu0 }
 0x21b   :  { %v318_v32 = vadd.f32 %v317_v29, %v236_v26  ;;  %v319_v33 = vpop.f32.mrb[3].mxu0 }
 0x21c   :  { %v320_v34 = vadd.f32 %v319_v33, %v240_v27 }
 0x21d   :  { %v404_v35 = vadd.f32 %v397_v28, %v318_v32 }
 0x21e   :  { %v557_v36 = vcombine.low %v318_v32, %v320_v34  ;;  %v405_v37 = vadd.f32 %v401_v30, %v320_v34 }
 0x220   :  { %664 = vmatprep.mubr.msk.f32.mxu1 %vm129_vm0, %v405_v37  ;;  %v599_v40 = vcombine.low %v404_v35, %v405_v37  ;;  %v564_v41 = vrot.slane %v557_v36, %v1173_v38 }
 0x221   :  { %534 = vmatmul.mubr.f32.vlgmr.msra.gmra.mrb[0].mxu1 %v404_v35 }
 0x222   :  { %v606_v42 = vrot.slane %v599_v40, %v1173_v38  ;;  %566 = vst.msk [vmem:[#allocation11] sm:$0xf] %vm1175_vm5, %v564_v41 }
 0x224   :  { %608 = vst.msk [vmem:[%s1257_s12] sm:$0xf] %vm1175_vm5, %v606_v42 }
 0x22a   :  { %v388_v45 = vpop.f32.mrb[4].mxu0 }
 0x22b   :  { %v389_v46 = vadd.f32 %v388_v45, %v244_v44  ;;  %v692_v47 = vpop.f32.mrb[5].mxu0 }
 0x22d   :  { %v568_v48 = vcombine.low %v320_v34, %v389_v46 }
 0x22f   :  { %v575_v49 = vrot.slane %v568_v48, %v1173_v38 }
 0x231   :  { %576 = vrot.lane.b32.xlu0 %v575_v49, %s1001_s13 }
 0x235   :  { %592 = vrot.lane.b32.xlu0 %v591_v51, %s1001_s13 }
 0x236   :  { %923 = shalt.err (!%p920_p2)
}
 0x237   :  { %s924_s27 = scalar_lea.hbm %s1254_s9, 64 }
 0x238   :  { %p925_p3 = scmp.ne.s32.totalorder %s1254_s9, %s924_s27  ;;  %p928_p4 = scmp.lt.u32.totalorder %s924_s27, %s1254_s9 }
 0x23a   :  { %p930_p5 = pnand %p928_p4, %p925_p3 }
 0x23c   :  { %933 = shalt.err (!%p930_p5)
}
 0x23d   :  { %620 = dma.vmem_to_hbm [thread:$0]  %s618_s1, 64, %s1254_s9, [#allocation4]  }
 0x23e   :  { %s1003_s16 = smov [#allocation12]   ;;  %s1004_s25 = smov [#allocation14]  }
 0x23f   :  { %s627_s23 = sshll.u32 %s1003_s16, 4  ;;  %s637_s26 = sshll.u32 %s1004_s25, 4  ;;  %s628_s23 = int_to_ptr.vmem [resolvable:$true] %s627_s23  ;;  %s638_s26 = int_to_ptr.vmem [resolvable:$true] %s637_s26 }
 0x240   :  { %s934_s3 = scalar_lea.vmem %s628_s23, 64  ;;  %p939_p7 = scmp.lt.s32.totalorder %s628_s23, %s628_s23 }
 0x241   :  { %p935_p6 = scmp.ne.s32.totalorder %s628_s23, %s934_s3  ;;  %p940_p8 = scmp.lt.s32.totalorder %s934_s3, %s934_s3 }
 0x243   :  { %p941_p9 = por %p940_p8, %p939_p7 }
 0x245   :  { %p942_p10 = pnand %p941_p9, %p935_p6 }
 0x2a3   :  { %v577_v52 = vpop.permute.xlu0 %576 }
 0x2a4   :  { %v578_v53 = vrot.slane %v577_v52, 2 }
 0x2a6   :  { %v579_v55 = vsel %vm129_vm0, %v577_v52, %v578_v53 }
 0x2a7   :  { %v593_v57 = vpop.permute.xlu0 %592  ;;  %581 = vst.msk [vmem:[#allocation12] sm:$0xf] %vm1175_vm5, %v579_v55 }
 0x2a8   :  { %v594_v58 = vrot.slane %v593_v57, 2 }
 0x2a9   :  { %945 = shalt.err (!%p942_p10)
}
 0x2aa   :  { %s946_s7 = scalar_lea.hbm %s1255_s10, 64 }
 0x2ab   :  { %p947_p11 = scmp.ne.s32.totalorder %s1255_s10, %s946_s7  ;;  %p950_p12 = scmp.lt.u32.totalorder %s946_s7, %s1255_s10 }
 0x2ad   :  { %p952_p13 = pnand %p950_p12, %p947_p11 }
 0x2af   :  { %955 = shalt.err (!%p952_p13)
}
 0x2b0   :  { %630 = dma.vmem_to_hbm [thread:$0]  %s628_s23, 64, %s1255_s10, [#allocation13]   ;;  %v595_v59 = vsel %vm129_vm0, %v593_v57, %v594_v58 }
 0x2b1   :  { %597 = vst.msk [vmem:[#allocation14] sm:$0xf] %vm1175_vm5, %v595_v59  ;;  %s956_s5 = scalar_lea.vmem %s638_s26, 64  ;;  %p961_p1 = scmp.lt.s32.totalorder %s638_s26, %s638_s26 }
 0x2b2   :  { %p957_p0 = scmp.ne.s32.totalorder %s638_s26, %s956_s5  ;;  %p962_p2 = scmp.lt.s32.totalorder %s956_s5, %s956_s5 }
 0x2b4   :  { %p963_p3 = por %p962_p2, %p961_p1 }
 0x2b6   :  { %p964_p4 = pnand %p963_p3, %p957_p0 }
 0x2b8   :  { %967 = shalt.err (!%p964_p4)
}
 0x2b9   :  { %s968_s1 = scalar_lea.hbm %s1256_s11, 64 }
 0x2ba   :  { %p969_p5 = scmp.ne.s32.totalorder %s1256_s11, %s968_s1  ;;  %p972_p6 = scmp.lt.u32.totalorder %s968_s1, %s1256_s11 }
 0x2bc   :  { %p974_p7 = pnand %p972_p6, %p969_p5 }
 0x2be   :  { %977 = shalt.err (!%p974_p7)
}
 0x2bf   :  { %640 = dma.vmem_to_hbm [thread:$0]  %s638_s26, 64, %s1256_s11, [#allocation13]   ;;  %v454_v60 = vld [vmem:[#allocation10] sm:$0x3] }
 0x2c0   :  { %v459_v61 = vrot.slane %v454_v60, %v1140_v54  ;;  %v463_v62 = vrot.slane %v454_v60, %v1143_v56 }
 0x2f4   :  { %v535_v63 = vpop.f32.mrb[0].mxu1 }
 0x2f5   :  { %v536_v1 = vadd.f32 %v535_v63, %v459_v61  ;;  %v537_v2 = vpop.f32.mrb[1].mxu1 }
 0x2f6   :  { %v538_v3 = vadd.f32 %v537_v2, %v463_v62 }
 0x2f8   :  { %v542_v4 = vcombine.low %v536_v1, %v538_v3 }
 0x2fa   :  { %v549_v5 = vrot.slane %v542_v4, %v1173_v38 }
 0x2fc   :  { %554 = vst.msk [vmem:[%s1253_s8] sm:$0xf] %vm1175_vm5, %v549_v5 }
 0x2fd   :  { %984 = dma.done.wait [#allocation4], 64  }
 0x2fe   :  { %985 = vsyncadd [#allocation4], 4294967232 }
 0x2ff   :  { %986 = dma.done.wait [#allocation13], 128  }
 0x300   :  { %987 = vsyncadd [#allocation13], 4294967168 }
 0x301   :  { %656 = vsyncpa [#allocation3], 1 }
 0x302   :  { %657 = vsyncpa [#allocation6], 1 }
 0x303   :  { %658 = vsyncpa [#allocation9], 1 }
 0x304   :  { %659 = vsyncpa [#allocation4], 1 }
 0x305   :  { %660 = vsyncpa [#allocation13], 1 }

</bundles_post_ra>
